<compile_context>
chip_gen: v5e
topology: v5e:2x2
jax: 0.10.0
libtpu: 0.0.40
codegen_flags: <defaults>
</compile_context>

<pallas_src>
import jax
import jax.numpy as jnp
from jax.experimental import pallas as pl
from jax.experimental.pallas import tpu as pltpu

_LANE = 128
_SUBLANE = 8
_MIN_GRID = 4          # keep >=4 grid steps on big inputs (v7x megacore + pipelining)


def _int_pow(x, k):
    """x**k for a static non-negative integer k using only VPU multiplies."""
    if k == 0:
        return jnp.ones_like(x)
    result = None
    base = x
    while k:
        if k & 1:
            result = base if result is None else result * base
        if k > 1:
            base = base * base
        k >>= 1
    return result


def _make_bell_kernel(inv_a, c, b, static_k, use_sqrt):
    """Kernel closure: a, b, c are compile-time constants (no SMEM traffic)."""
    def kernel(x_ref, o_ref):
        xv = x_ref[...].astype(jnp.float32)
        t = (xv - c) * inv_a                      # precomputed 1/a: no vector divide
        dist = t * t
        if static_k is not None:
            p = _int_pow(dist, static_k)          # integer part: VPU multiplies only
            if use_sqrt:
                p = p * jnp.sqrt(dist)            # half-integer part: single EUP op
        else:
            p = jnp.power(dist, jnp.float32(b))   # general b: exp+log on EUP
        o_ref[...] = (1.0 / (1.0 + p)).astype(o_ref.dtype)   # exact recip (1e-5 tol)
    return kernel


def _bell_jnp(xf, inv_a, c, b):
    """Plain-jnp fallback / tiny tail epilogue (lane-unaligned leftovers)."""
    t = (xf.astype(jnp.float32) - c) * inv_a
    dist = t * t
    return (1.0 / (1.0 + jnp.power(dist, jnp.float32(b)))).astype(xf.dtype)


def _default_block_bytes():
    """Per-generation streaming block size (amortise ~0.35us/grid-step)."""
    try:
        kind = jax.devices()[0].device_kind.lower()
    except Exception:
        return 2 << 20
    if "v7" in kind:
        return 6 << 20            # ~3.2 TB/s per TC: larger blocks cut step overhead
    if "v6" in kind:
        return 4 << 20
    return 2 << 20                # v5e / unknown: fits 16 MiB default scoped VMEM


def bell_memb_func(x, a, b, c, *, block_bytes=None):
    """Generalised Bell membership: 1 / (1 + ((x - c)/a)^2)^b, elementwise."""
    orig_shape = x.shape
    orig_dtype = x.dtype

    a = float(a)
    b = float(b)
    c = float(c)
    inv_a = 1.0 / a

    itemsize = jnp.dtype(orig_dtype).itemsize
    # dtype-aware sublane packing (f32: 8, bf16: 16, int8/fp8: 32)
    sublane = max(_SUBLANE, 32 // max(itemsize, 1))

    # Specialise jnp.power away for integer and half-integer b >= 0.
    two_b = 2.0 * b
    if two_b == int(two_b) and 0.0 <= b <= 64.0:
        static_k = int(b)                 # floor(b)
        use_sqrt = (int(two_b) % 2) == 1  # leftover 0.5 -> one sqrt
    else:
        static_k, use_sqrt = None, False

    if block_bytes is None:
        block_bytes = _default_block_bytes()

    xf = x.reshape(-1)
    n = xf.size

    # Widest lane count in {512, 256, 128} dividing n: zero padding / slicing.
    lanes = next((w for w in (512, 256, 128) if n % w == 0), None)
    if lanes is None:
        # Rare, truly lane-unaligned size: kernel on the 128-aligned prefix,
        # tiny (<128 elem) plain-jnp epilogue for the tail.
        lanes = _LANE
    n_main = (n // lanes) * lanes

    if n_main == 0:
        return _bell_jnp(xf, inv_a, c, b).reshape(orig_shape)

    rows = n_main // lanes
    if rows <= sublane:
        block_rows = rows                 # single block == full array dims (valid)
    else:
        target_rows = max(sublane, (block_bytes // itemsize) // lanes)
        target_rows -= target_rows % sublane
        # cap block size so large inputs get >= _MIN_GRID steps
        cap = pl.cdiv(pl.cdiv(rows, _MIN_GRID), sublane) * sublane
        block_rows = max(sublane, min(target_rows, cap))
    grid = (pl.cdiv(rows, block_rows),)   # partial last block handled by Pallas

    x_main = xf if n_main == n else xf[:n_main]
    x2d = x_main.reshape(rows, lanes)     # metadata-only reshape when aligned

    if static_k is None:
        transcendentals = 2 * n_main      # log + exp
    elif use_sqrt:
        transcendentals = n_main
    else:
        transcendentals = 0

    out2d = pl.pallas_call(
        _make_bell_kernel(inv_a, c, b, static_k, use_sqrt),
        out_shape=jax.ShapeDtypeStruct((rows, lanes), orig_dtype),
        grid_spec=pltpu.PrefetchScalarGridSpec(
            num_scalar_prefetch=0,
            grid=grid,
            in_specs=[pl.BlockSpec((block_rows, lanes), lambda i: (i, 0))],
            out_specs=pl.BlockSpec((block_rows, lanes), lambda i: (i, 0)),
        ),
        compiler_params=pltpu.CompilerParams(
            dimension_semantics=("parallel",),
            vmem_limit_bytes=min(48 << 20, max(32 << 20, 6 * block_bytes)),
        ),
        cost_estimate=pl.CostEstimate(
            flops=8 * n_main,
            transcendentals=transcendentals,
            bytes_accessed=2 * n_main * itemsize,
        ),
    )(x2d)

    out = out2d.reshape(-1)
    if n_main != n:
        # TODO(synk): truly lane-unaligned sizes still pay one stitch copy here.
        out = jnp.concatenate([out, _bell_jnp(xf[n_main:], inv_a, c, b)])
    return out.reshape(orig_shape)


if __name__ == "__main__":
    key = jax.random.PRNGKey(0)
    # NCHW-style input, small shape
    x = jax.random.normal(key, (2, 4, 16, 16), dtype=jnp.float32)
    a, b, c = 1.5, 2.0, 0.25

    y = jax.block_until_ready(bell_memb_func(x, a, b, c))
    dist = ((x - c) / a) ** 2
    y_ref = 1.0 / (1.0 + jnp.power(dist, b))
    assert y.shape == x.shape and y.dtype == x.dtype
    assert jnp.allclose(y, y_ref, atol=1e-5, rtol=1e-5)

    # half-integer b path (VPU multiplies + one sqrt, no exp/log)
    y2 = jax.block_until_ready(bell_memb_func(x, 1.5, 2.5, 0.25))
    assert jnp.allclose(y2, 1.0 / (1.0 + jnp.power(dist, 2.5)), atol=1e-5, rtol=1e-5)

    # general non-half-integer b path (jnp.power inside the kernel)
    y3 = jax.block_until_ready(bell_memb_func(x, 1.5, 1.7, 0.25))
    assert jnp.allclose(y3, 1.0 / (1.0 + jnp.power(dist, 1.7)), atol=1e-5, rtol=1e-5)

    # shape whose row count is not a multiple of the block rows:
    # exercises the partial last block (no pad, no slice)
    x2 = jax.random.normal(jax.random.PRNGKey(1), (3, 5, 16, 16), dtype=jnp.float32)
    y4 = jax.block_until_ready(bell_memb_func(x2, 0.8, 3.0, -0.1))
    d2 = ((x2 + 0.1) / 0.8) ** 2
    assert y4.shape == x2.shape and y4.dtype == x2.dtype
    assert jnp.allclose(y4, 1.0 / (1.0 + jnp.power(d2, 3.0)), atol=1e-5, rtol=1e-5)

    print("KERNEL_OK")
</pallas_src>

<mosaic_0001>
module attributes {stable_mosaic.version = 11 : i64} {
  func.func @kernel(%arg0: i32, %arg1: memref<4x512xf32, #tpu.memory_space<vmem>>, %arg2: memref<4x512xf32, #tpu.memory_space<vmem>>) attributes {dimension_semantics = [#tpu.dimension_semantics<parallel>], iteration_bounds = array<i64: 1>, scalar_prefetch = 0 : i64, scratch_operands = 0 : i64, tpu.core_type = #tpu.core_type<tc>, window_params = [{transform_indices = @transform_0, window_bounds = array<i64: 4, 512>}, {transform_indices = @transform_1, window_bounds = array<i64: 4, 512>}]} {
    %c0 = arith.constant 0 : index
    %c0_0 = arith.constant 0 : index
    %0 = vector.load %arg1[%c0, %c0_0] : memref<4x512xf32, #tpu.memory_space<vmem>>, vector<4x512xf32>
    %cst = arith.constant 2.500000e-01 : f32
    %1 = vector.broadcast %cst : f32 to vector<4x512xf32>
    %2 = arith.subf %0, %1 : vector<4x512xf32>
    %cst_1 = arith.constant 0.666666686 : f32
    %3 = vector.broadcast %cst_1 : f32 to vector<4x512xf32>
    %4 = arith.mulf %2, %3 : vector<4x512xf32>
    %5 = arith.mulf %4, %4 : vector<4x512xf32>
    %6 = arith.mulf %5, %5 : vector<4x512xf32>
    %cst_2 = arith.constant 1.000000e+00 : f32
    %7 = vector.broadcast %cst_2 : f32 to vector<4x512xf32>
    %8 = arith.addf %7, %6 : vector<4x512xf32>
    %cst_3 = arith.constant 1.000000e+00 : f32
    %9 = vector.broadcast %cst_3 : f32 to vector<4x512xf32>
    %10 = arith.divf %9, %8 : vector<4x512xf32>
    %c0_4 = arith.constant 0 : index
    %c0_5 = arith.constant 0 : index
    %11 = vector.load %arg2[%c0_4, %c0_5] : memref<4x512xf32, #tpu.memory_space<vmem>>, vector<4x512xf32>
    tpu.vector_store %arg2[%c0_4, %c0_5], %10 {strides = array<i32>} : memref<4x512xf32, #tpu.memory_space<vmem>>, vector<4x512xf32>,
    return
  }
  func.func @transform_0(%arg0: i32) -> (i32, i32) {
    %c0_i32 = arith.constant 0 : i32
    %c0_i32_0 = arith.constant 0 : i32
    return %arg0, %c0_i32 : i32, i32
  }
  func.func @transform_1(%arg0: i32) -> (i32, i32) {
    %c0_i32 = arith.constant 0 : i32
    %c0_i32_0 = arith.constant 0 : i32
    return %arg0, %c0_i32 : i32, i32
  }
}

</mosaic_0001>

<bundles_post_ra>
// kernel: tpu_custom_call.1
= control target key start
LH: loop header
LB: loop body
LE: loop exit
PB: predicated region body
PF: predicated region fallthrough
CT: control target
= control target key end

     0   :  { %6 = vsyncpa [#allocation3], 0  ;;  %s162_s0 = inlined_call_operand.hbm [shape: f32[4,512], index: 0, kind: input, shape index: {}]   ;;  %s163_s1 = inlined_call_operand.hbm [shape: f32[4,512], index: 1, kind: output, shape index: {}]  }
   0x1   :  { %7 = vsyncpa [#allocation4], 0  ;;  %s13_s8 = sshll.u32 %s162_s0, 4  ;;  %s144_s9 = smov [#allocation2]   ;;  %s14_s8 = int_to_ptr.hbm [resolvable:$true] %s13_s8 }
   0x2   :  { %s15_s10 = sshll.u32 %s144_s9, 4  ;;  %s16_s10 = int_to_ptr.vmem [resolvable:$true] %s15_s10 }
   0x3   :  { %18 = dma.hbm_to_vmem [thread:$0]  %s14_s8, 256, %s16_s10, [#allocation3]  }
   0x4   :  { %140 = dma.done.wait [#allocation3], 256  }
   0x5   :  { %141 = vsyncadd [#allocation3], 4294967040  ;;  %v23_v0 = vld [vmem:[#allocation2] sm:$0xff]  ;;  %v24_v1 = vld [vmem:[#allocation2 + $0x8] sm:$0xff]  ;;  %s145_s0 = smov [#allocation5]   ;;  %s74_s14 = sshll.u32 %s163_s1, 4  ;;  %s75_s14 = int_to_ptr.hbm [resolvable:$true] %s74_s14 }
   0x6   :  { %v84_v2 = vadd.f32 -0.25, %v23_v0  ;;  %v85_v3 = vadd.f32 -0.25, %v24_v1  ;;  %s72_s11 = sshll.u32 %s145_s0, 4  ;;  %s73_s11 = int_to_ptr.vmem [resolvable:$true] %s72_s11 }
   0x8   :  { %v27_v4 = vmul.f32 0.6666667, %v84_v2  ;;  %v28_v5 = vmul.f32 0.6666667, %v85_v3 }
   0xa   :  { %v29_v6 = vmul.f32 %v27_v4, %v27_v4  ;;  %v30_v7 = vmul.f32 %v28_v5, %v28_v5 }
   0xc   :  { %v31_v8 = vmul.f32 %v29_v6, %v29_v6  ;;  %v32_v9 = vmul.f32 %v30_v7, %v30_v7 }
   0xe   :  { %v33_v10 = vadd.f32 1.0, %v31_v8  ;;  %v34_v11 = vadd.f32 1.0, %v32_v9 }
  0x10   :  { %88 = vrcp.f32 %v33_v10  ;;  %vm40_vm0 = vweird.f32 %v33_v10  ;;  %v46_v15 = vand.u32 2147483648, %v33_v10  ;;  %v44_v18 = vand.u32 2147483647, %v33_v10 }
  0x11   :  { %90 = vrcp.f32 %v34_v11  ;;  %v61_v19 = vand.u32 2147483648, %v34_v11  ;;  %vm55_vm2 = vweird.f32 %v34_v11  ;;  %v59_v21 = vand.u32 2147483647, %v34_v11 }
  0x12   :  { %v47_v23 = vor.u32 1.1754944e-38, %v46_v15  ;;  %vm45_vm5 = vcmp.eq.f32.partialorder %v44_v18, 8.507059e+37 }
  0x13   :  { %v62_v26 = vor.u32 1.1754944e-38, %v61_v19  ;;  %vm60_vm7 = vcmp.eq.f32.partialorder %v59_v21, 8.507059e+37 }
  0x16   :  { %v89_v12 = vpop.eup %88 }
  0x17   :  { %v91_v13 = vpop.eup %90  ;;  %v36_v14 = vmul.f32 %v89_v12, %v33_v10  ;;  %vm41_vm1 = vweird.f32 %v89_v12 }
  0x18   :  { %v51_v16 = vmul.f32 %v91_v13, %v34_v11  ;;  %vm56_vm3 = vweird.f32 %v91_v13  ;;  %vm42_vm4 = vmor %vm40_vm0, %vm41_vm1 }
  0x19   :  { %v37_v17 = vsub.f32 1.0, %v36_v14  ;;  %vm57_vm6 = vmor %vm55_vm2, %vm56_vm3 }
  0x1a   :  { %v52_v20 = vsub.f32 1.0, %v51_v16 }
  0x1b   :  { %v38_v22 = vmul.f32 %v89_v12, %v37_v17 }
  0x1c   :  { %v53_v24 = vmul.f32 %v91_v13, %v52_v20 }
  0x1d   :  { %v39_v25 = vadd.f32 %v89_v12, %v38_v22 }
  0x1e   :  { %v54_v27 = vadd.f32 %v91_v13, %v53_v24 }
  0x1f   :  { %v43_v28 = vsel %vm42_vm4, %v89_v12, %v39_v25 }
  0x20   :  { %v48_v29 = vsel %vm45_vm5, %v47_v23, %v43_v28  ;;  %v58_v30 = vsel %vm57_vm6, %v91_v13, %v54_v27 }
  0x21   :  { %65 = vst [vmem:[#allocation5] sm:$0xff] %v48_v29  ;;  %v63_v31 = vsel %vm60_vm7, %v62_v26, %v58_v30 }
  0x22   :  { %66 = vst [vmem:[#allocation5 + $0x8] sm:$0xff] %v63_v31 }
  0x23   :  { %77 = dma.vmem_to_hbm [thread:$0]  %s73_s11, 256, %s75_s14, [#allocation4]  }
  0x24   :  { %142 = dma.done.wait [#allocation4], 256  }
  0x25   :  { %143 = vsyncadd [#allocation4], 4294967040 }
  0x26   :  { %82 = vsyncpa [#allocation3], 1 }
  0x27   :  { %83 = vsyncpa [#allocation4], 1 }

</bundles_post_ra>
